<compile_context>
chip_gen: v7x
topology: tpu7x:2x2x1
jax: 0.10.0
libtpu: 0.0.40
codegen_flags: <defaults>
</compile_context>

<pallas_src>
import functools

import jax
import jax.numpy as jnp
from jax import lax
from jax.experimental import pallas as pl
from jax.experimental.pallas import tpu as pltpu

LANES = 128
SUBLANES = 8
CHUNK_ROWS = 512            # in-kernel strip-mining granularity (256 KiB f32 per chunk)
MAX_TILE_ROWS = 4096        # 4096 x 128 x 4 B = 2 MiB per f32 I/O buffer
VMEM_LIMIT_BYTES = 40 << 20  # explicit headroom (<= physical VMEM on v5e/v6e/v7x)
FAST_PATH_ELEMENTS = 1 << 18  # below this, fused XLA elementwise beats a pallas_call


def _round_up(x, m):
    return ((x + m - 1) // m) * m


def _plan_tiles(rows, base, want_splits=2):
    """Pick (tile_rows, chunk_rows, n_splits, steps, padded_rows)."""
    if rows <= CHUNK_ROWS:
        tile_rows = _round_up(rows, base)
        chunk_rows = tile_rows
    else:
        tiles_wanted = max(want_splits, pl.cdiv(rows, MAX_TILE_ROWS))
        tile_rows = min(MAX_TILE_ROWS,
                        _round_up(pl.cdiv(rows, tiles_wanted), CHUNK_ROWS))
        chunk_rows = CHUNK_ROWS
    n_splits = want_splits if rows > tile_rows else 1
    steps = pl.cdiv(rows, n_splits * tile_rows)
    padded_rows = n_splits * steps * tile_rows
    return tile_rows, chunk_rows, n_splits, steps, padded_rows


def _focal_loss_tile(x, t, alpha, gamma):
    """Per-element focal loss on one VMEM chunk (f32 math, single exp)."""
    x = x.astype(jnp.float32)
    t = t.astype(jnp.float32)
    e = jnp.exp(-jnp.abs(x))  # exp(-|x|), shared by BCE and sigmoid
    # numerically stable BCE-with-logits (reduction='none', weight=None)
    bce = jnp.maximum(x, 0.0) - x * t + jnp.log1p(e)
    d = 1.0 + e
    # approx EUP reciprocal + 2 Newton-Raphson refinements (VALU) -> full f32 accuracy
    r = pl.reciprocal(d, approx=True)
    r = r * (2.0 - d * r)
    r = r * (2.0 - d * r)
    p = jnp.where(x >= 0.0, r, e * r)          # sigmoid(x) without a second exp
    one_minus_pt = p + t - 2.0 * p * t          # == 1 - (p*t + (1-p)*(1-t))
    if float(gamma) == 2.0:                     # gamma is a static Python number
        focal_w = one_minus_pt * one_minus_pt
    else:
        focal_w = jnp.power(one_minus_pt, jnp.float32(gamma))
    a = jnp.float32(alpha)
    alpha_t = (1.0 - a) + (2.0 * a - 1.0) * t   # == alpha*t + (1-alpha)*(1-t)
    return alpha_t * focal_w * bce


def _focal_reduce_kernel(x_ref, t_ref, o_ref, *, alpha, gamma, chunk_rows,
                         n_valid, padded):
    """mean/sum path: accumulate per-split partial sums into an (8,128) output block."""
    j = pl.program_id(1)

    @pl.when(j == 0)
    def _():
        o_ref[...] = jnp.zeros_like(o_ref)

    tile_rows = x_ref.shape[0]
    num_chunks = tile_rows // chunk_rows
    tile_row0 = (pl.program_id(0) * pl.num_programs(1) + j) * tile_rows

    def chunk_body(c, acc):
        r0 = pl.multiple_of(c * chunk_rows, SUBLANES)
        x = x_ref[pl.ds(r0, chunk_rows), :]
        t = t_ref[pl.ds(r0, chunk_rows), :]
        loss = _focal_loss_tile(x, t, alpha, gamma)
        if padded:
            # mask out elements past the true element count (padded tail)
            row = tile_row0 + r0 + lax.broadcasted_iota(jnp.int32, loss.shape, 0)
            lane = lax.broadcasted_iota(jnp.int32, loss.shape, 1)
            flat = row * LANES + lane
            loss = jnp.where(flat < n_valid, loss, 0.0)
        # fold the chunk down to one vreg with elementwise (VPU) adds only
        part = jnp.sum(loss.reshape(chunk_rows // SUBLANES, SUBLANES, LANES), axis=0)
        return acc + part

    partial = lax.fori_loop(0, num_chunks, chunk_body,
                            jnp.zeros((SUBLANES, LANES), jnp.float32),
                            unroll=True)
    o_ref[...] += partial


def _focal_elementwise_kernel(x_ref, t_ref, o_ref, *, alpha, gamma, chunk_rows):
    """reduction='none' path: strip-mined elementwise loss."""
    tile_rows = x_ref.shape[0]
    num_chunks = tile_rows // chunk_rows

    def chunk_body(c, carry):
        r0 = pl.multiple_of(c * chunk_rows, SUBLANES)
        loss = _focal_loss_tile(x_ref[pl.ds(r0, chunk_rows), :],
                                t_ref[pl.ds(r0, chunk_rows), :], alpha, gamma)
        o_ref[pl.ds(r0, chunk_rows), :] = loss.astype(o_ref.dtype)
        return carry

    lax.fori_loop(0, num_chunks, chunk_body, 0, unroll=True)


def _focal_loss_jnp(inputs, targets, alpha, gamma, reduction):
    """Small-input fast path / reference formula (plain fused XLA)."""
    x = inputs.astype(jnp.float32)
    t = targets.astype(jnp.float32)
    bce = jnp.maximum(x, 0.0) - x * t + jnp.log1p(jnp.exp(-jnp.abs(x)))
    p = jax.nn.sigmoid(x)
    p_t = p * t + (1.0 - p) * (1.0 - t)
    loss = (alpha * t + (1.0 - alpha) * (1.0 - t)) * (1.0 - p_t) ** gamma * bce
    if reduction == "mean":
        return loss.mean()
    if reduction == "sum":
        return loss.sum()
    return loss.astype(inputs.dtype)


def weighted_focal_loss(inputs, targets, *, alpha=0.25, gamma=2.0, weight=None,
                        reduction="mean", force_pallas=False):
    """Pallas implementation of WeightedFocalLoss.forward."""
    # TODO(synk): per-class `weight` tensor of shape [2] (BCEWithLogitsLoss weight)
    # is not wired in; module default is weight=None.
    if weight is not None:
        raise NotImplementedError("weight=None only")
    assert inputs.shape == targets.shape
    orig_shape = inputs.shape
    n = int(inputs.size)

    if n == 0 or (not force_pallas and n < FAST_PATH_ELEMENTS):
        return _focal_loss_jnp(inputs, targets, alpha, gamma, reduction)

    itemsize = jnp.dtype(inputs.dtype).itemsize
    base = {1: 32, 2: 16}.get(itemsize, SUBLANES)  # sublane packing granularity

    rows = pl.cdiv(n, LANES)
    tile_rows, chunk_rows, n_splits, steps, padded_rows = _plan_tiles(rows, base)
    padded_n = padded_rows * LANES
    needs_pad = padded_n != n

    x_flat = inputs.reshape(-1)
    t_flat = targets.reshape(-1)
    if needs_pad:
        pad = padded_n - n
        x_flat = jnp.pad(x_flat, (0, pad))
        t_flat = jnp.pad(t_flat, (0, pad))
    x2d = x_flat.reshape(padded_rows, LANES)
    t2d = t_flat.reshape(padded_rows, LANES)

    in_specs = [
        pl.BlockSpec((tile_rows, LANES), lambda s, j: (s * steps + j, 0)),
        pl.BlockSpec((tile_rows, LANES), lambda s, j: (s * steps + j, 0)),
    ]

    if reduction == "none":
        kernel = functools.partial(_focal_elementwise_kernel, alpha=alpha,
                                   gamma=gamma, chunk_rows=chunk_rows)
        out = pl.pallas_call(
            kernel,
            out_shape=jax.ShapeDtypeStruct((padded_rows, LANES), inputs.dtype),
            grid_spec=pltpu.PrefetchScalarGridSpec(
                num_scalar_prefetch=0,
                grid=(n_splits, steps),
                in_specs=in_specs,
                out_specs=pl.BlockSpec((tile_rows, LANES),
                                       lambda s, j: (s * steps + j, 0)),
            ),
            compiler_params=pltpu.CompilerParams(
                dimension_semantics=("parallel", "parallel"),
                vmem_limit_bytes=VMEM_LIMIT_BYTES),
        )(x2d, t2d)
        out = out.reshape(-1)
        if needs_pad:
            out = out[:n]
        return out.reshape(orig_shape)

    # --- mean / sum: 2-way outer split (megacore) x inner reduction sweep ---
    kernel = functools.partial(_focal_reduce_kernel, alpha=alpha, gamma=gamma,
                               chunk_rows=chunk_rows, n_valid=n, padded=needs_pad)
    partials = pl.pallas_call(
        kernel,
        out_shape=jax.ShapeDtypeStruct((n_splits * SUBLANES, LANES), jnp.float32),
        grid_spec=pltpu.PrefetchScalarGridSpec(
            num_scalar_prefetch=0,
            grid=(n_splits, steps),
            in_specs=in_specs,
            out_specs=pl.BlockSpec((SUBLANES, LANES), lambda s, j: (s, 0)),
        ),
        compiler_params=pltpu.CompilerParams(
            dimension_semantics=("parallel", "arbitrary"),
            vmem_limit_bytes=VMEM_LIMIT_BYTES),
    )(x2d, t2d)

    total = jnp.sum(partials, dtype=jnp.float32)
    if reduction == "mean":
        return total / jnp.float32(n)
    return total


def _reference(inputs, targets, alpha=0.25, gamma=2.0, reduction="mean"):
    return _focal_loss_jnp(inputs, targets, alpha, gamma, reduction)


if __name__ == "__main__":
    key = jax.random.PRNGKey(0)
    k1, k2, k3, k4, k5, k6 = jax.random.split(key, 6)

    # --- small NCHW-style logits/targets: batch=2, channels=4, spatial=16 ---
    shape = (2, 4, 16, 16)
    inputs = jax.random.normal(k1, shape, dtype=jnp.float32) * 2.0
    targets = jax.random.bernoulli(k2, p=0.3, shape=shape).astype(jnp.float32)

    # Pallas path forced (small shapes otherwise use the fused-XLA fast path)
    loss_mean = jax.block_until_ready(
        weighted_focal_loss(inputs, targets, reduction="mean", force_pallas=True))
    assert jnp.allclose(loss_mean, _reference(inputs, targets, reduction="mean"),
                        rtol=1e-5, atol=1e-6)

    loss_sum = jax.block_until_ready(
        weighted_focal_loss(inputs, targets, reduction="sum", force_pallas=True))
    assert jnp.allclose(loss_sum, _reference(inputs, targets, reduction="sum"),
                        rtol=1e-5, atol=1e-5)

    loss_none = jax.block_until_ready(
        weighted_focal_loss(inputs, targets, reduction="none", force_pallas=True))
    assert loss_none.shape == shape
    assert jnp.allclose(loss_none, _reference(inputs, targets, reduction="none"),
                        rtol=1e-5, atol=1e-6)

    # --- unaligned shape: exercises pad + in-kernel mask + output slicing ---
    shape_u = (2, 3, 17, 13)
    inputs_u = jax.random.normal(k3, shape_u, dtype=jnp.float32) * 2.0
    targets_u = jax.random.bernoulli(k4, p=0.3, shape=shape_u).astype(jnp.float32)

    loss_mean_u = jax.block_until_ready(
        weighted_focal_loss(inputs_u, targets_u, reduction="mean", force_pallas=True))
    assert jnp.allclose(loss_mean_u, _reference(inputs_u, targets_u, reduction="mean"),
                        rtol=1e-5, atol=1e-6)

    loss_none_u = jax.block_until_ready(
        weighted_focal_loss(inputs_u, targets_u, reduction="none", force_pallas=True))
    assert loss_none_u.shape == shape_u
    assert jnp.allclose(loss_none_u, _reference(inputs_u, targets_u, reduction="none"),
                        rtol=1e-5, atol=1e-6)

    # --- moderately larger aligned shape: exercises 2-way split grid ---
    shape_m = (4, 8, 64, 64)
    inputs_m = jax.random.normal(k5, shape_m, dtype=jnp.float32) * 2.0
    targets_m = jax.random.bernoulli(k6, p=0.3, shape=shape_m).astype(jnp.float32)

    loss_mean_m = jax.block_until_ready(
        weighted_focal_loss(inputs_m, targets_m, reduction="mean", force_pallas=True))
    assert jnp.allclose(loss_mean_m, _reference(inputs_m, targets_m, reduction="mean"),
                        rtol=1e-5, atol=1e-6)

    # --- default small-input fast path (fused XLA, no pallas_call) ---
    loss_fast = jax.block_until_ready(
        weighted_focal_loss(inputs, targets, reduction="mean"))
    assert jnp.allclose(loss_fast, _reference(inputs, targets, reduction="mean"),
                        rtol=1e-5, atol=1e-6)

    print("KERNEL_OK")
</pallas_src>

<mosaic_0001>
module attributes {stable_mosaic.version = 11 : i64} {
  func.func @_focal_reduce_kernel(%arg0: i32, %arg1: i32, %arg2: memref<16x128xf32, #tpu.memory_space<vmem>>, %arg3: memref<16x128xf32, #tpu.memory_space<vmem>>, %arg4: memref<8x128xf32, #tpu.memory_space<vmem>>) attributes {dimension_semantics = [#tpu.dimension_semantics<parallel>, #tpu.dimension_semantics<arbitrary>], iteration_bounds = array<i64: 1, 1>, scalar_prefetch = 0 : i64, scratch_operands = 0 : i64, tpu.core_type = #tpu.core_type<tc>, window_params = [{transform_indices = @transform_0, window_bounds = array<i64: 16, 128>}, {transform_indices = @transform_1, window_bounds = array<i64: 16, 128>}, {transform_indices = @transform_2, window_bounds = array<i64: 8, 128>}]} {
    %c0_i32 = arith.constant 0 : i32
    %0 = arith.cmpi eq, %arg1, %c0_i32 : i32
    %1 = arith.extui %0 : i1 to i32
    %c0_i32_0 = arith.constant 0 : i32
    %2 = arith.cmpi ne, %1, %c0_i32_0 : i32
    scf.if %2 {
      %cst_20 = arith.constant 0.000000e+00 : f32
      %56 = vector.broadcast %cst_20 : f32 to vector<8x128xf32>
      %c0_21 = arith.constant 0 : index
      %c0_22 = arith.constant 0 : index
      %57 = vector.load %arg4[%c0_21, %c0_22] : memref<8x128xf32, #tpu.memory_space<vmem>>, vector<8x128xf32>
      tpu.vector_store %arg4[%c0_21, %c0_22], %56 {strides = array<i32>} : memref<8x128xf32, #tpu.memory_space<vmem>>, vector<8x128xf32>,
    } else {
    }
    %cst = arith.constant 0.000000e+00 : f32
    %3 = vector.broadcast %cst : f32 to vector<8x128xf32>
    %c0_i32_1 = arith.constant 0 : i32
    %c16_i32 = arith.constant 16 : i32
    %4 = arith.muli %c0_i32_1, %c16_i32 : i32
    %5 = tpu.assume_multiple %4, 8 : i32
    %6 = arith.index_cast %5 : i32 to index
    %c0 = arith.constant 0 : index
    %7 = vector.load %arg2[%6, %c0] : memref<16x128xf32, #tpu.memory_space<vmem>>, vector<16x128xf32>
    %8 = arith.index_cast %5 : i32 to index
    %c0_2 = arith.constant 0 : index
    %9 = vector.load %arg3[%8, %c0_2] : memref<16x128xf32, #tpu.memory_space<vmem>>, vector<16x128xf32>
    %10 = math.absf %7 : vector<16x128xf32>
    %cst_3 = arith.constant 0.000000e+00 : f32
    %11 = vector.broadcast %cst_3 : f32 to vector<16x128xf32>
    %12 = arith.subf %11, %10 : vector<16x128xf32>
    %13 = math.exp %12 : vector<16x128xf32>
    %cst_4 = arith.constant 0.000000e+00 : f32
    %14 = vector.broadcast %cst_4 : f32 to vector<16x128xf32>
    %15 = arith.maximumf %7, %14 : vector<16x128xf32>
    %16 = arith.mulf %7, %9 : vector<16x128xf32>
    %17 = arith.subf %15, %16 : vector<16x128xf32>
    %18 = math.log1p %13 : vector<16x128xf32>
    %19 = arith.addf %17, %18 : vector<16x128xf32>
    %cst_5 = arith.constant 1.000000e+00 : f32
    %20 = vector.broadcast %cst_5 : f32 to vector<16x128xf32>
    %21 = arith.addf %20, %13 : vector<16x128xf32>
    %22 = tpu.reciprocal %21 {approx = true} : vector<16x128xf32> -> vector<16x128xf32>
    %23 = arith.mulf %21, %22 : vector<16x128xf32>
    %cst_6 = arith.constant 2.000000e+00 : f32
    %24 = vector.broadcast %cst_6 : f32 to vector<16x128xf32>
    %25 = arith.subf %24, %23 : vector<16x128xf32>
    %26 = arith.mulf %22, %25 : vector<16x128xf32>
    %27 = arith.mulf %21, %26 : vector<16x128xf32>
    %cst_7 = arith.constant 2.000000e+00 : f32
    %28 = vector.broadcast %cst_7 : f32 to vector<16x128xf32>
    %29 = arith.subf %28, %27 : vector<16x128xf32>
    %30 = arith.mulf %26, %29 : vector<16x128xf32>
    %cst_8 = arith.constant 0.000000e+00 : f32
    %31 = vector.broadcast %cst_8 : f32 to vector<16x128xf32>
    %32 = arith.cmpf oge, %7, %31 : vector<16x128xf32>
    %33 = arith.mulf %13, %30 : vector<16x128xf32>
    %34 = arith.select %32, %30, %33 : vector<16x128xi1>, vector<16x128xf32>
    %35 = arith.addf %34, %9 : vector<16x128xf32>
    %cst_9 = arith.constant 2.000000e+00 : f32
    %36 = vector.broadcast %cst_9 : f32 to vector<16x128xf32>
    %37 = arith.mulf %36, %34 : vector<16x128xf32>
    %38 = arith.mulf %37, %9 : vector<16x128xf32>
    %39 = arith.subf %35, %38 : vector<16x128xf32>
    %40 = arith.mulf %39, %39 : vector<16x128xf32>
    %cst_10 = arith.constant 1.000000e+00 : f32
    %cst_11 = arith.constant 2.500000e-01 : f32
    %41 = arith.subf %cst_10, %cst_11 : f32
    %cst_12 = arith.constant 2.000000e+00 : f32
    %cst_13 = arith.constant 2.500000e-01 : f32
    %42 = arith.mulf %cst_12, %cst_13 : f32
    %cst_14 = arith.constant 1.000000e+00 : f32
    %43 = arith.subf %42, %cst_14 : f32
    %44 = vector.broadcast %43 : f32 to vector<16x128xf32>
    %45 = arith.mulf %44, %9 : vector<16x128xf32>
    %46 = vector.broadcast %41 : f32 to vector<16x128xf32>
    %47 = arith.addf %46, %45 : vector<16x128xf32>
    %48 = arith.mulf %47, %40 : vector<16x128xf32>
    %49 = arith.mulf %48, %19 : vector<16x128xf32>
    %50 = vector.shape_cast %49 : vector<16x128xf32> to vector<2x8x128xf32>
    %cst_15 = arith.constant dense<0.000000e+00> : vector<8x128xf32>
    %51 = vector.multi_reduction <add>, %50, %cst_15 [0] : vector<2x8x128xf32> to vector<8x128xf32>
    %52 = arith.addf %3, %51 : vector<8x128xf32>
    %c1_i32 = arith.constant 1 : i32
    %c0_16 = arith.constant 0 : index
    %c0_17 = arith.constant 0 : index
    %53 = vector.load %arg4[%c0_16, %c0_17] : memref<8x128xf32, #tpu.memory_space<vmem>>, vector<8x128xf32>
    %54 = arith.addf %53, %52 : vector<8x128xf32>
    %c0_18 = arith.constant 0 : index
    %c0_19 = arith.constant 0 : index
    %55 = vector.load %arg4[%c0_18, %c0_19] : memref<8x128xf32, #tpu.memory_space<vmem>>, vector<8x128xf32>
    tpu.vector_store %arg4[%c0_18, %c0_19], %54 {strides = array<i32>} : memref<8x128xf32, #tpu.memory_space<vmem>>, vector<8x128xf32>,
    return
  }
  func.func @transform_0(%arg0: i32, %arg1: i32) -> (i32, i32) {
    %c1_i32 = arith.constant 1 : i32
    %0 = arith.muli %arg0, %c1_i32 : i32
    %1 = arith.addi %0, %arg1 : i32
    %c0_i32 = arith.constant 0 : i32
    %c0_i32_0 = arith.constant 0 : i32
    return %1, %c0_i32 : i32, i32
  }
  func.func @transform_1(%arg0: i32, %arg1: i32) -> (i32, i32) {
    %c1_i32 = arith.constant 1 : i32
    %0 = arith.muli %arg0, %c1_i32 : i32
    %1 = arith.addi %0, %arg1 : i32
    %c0_i32 = arith.constant 0 : i32
    %c0_i32_0 = arith.constant 0 : i32
    return %1, %c0_i32 : i32, i32
  }
  func.func @transform_2(%arg0: i32, %arg1: i32) -> (i32, i32) {
    %c0_i32 = arith.constant 0 : i32
    %c0_i32_0 = arith.constant 0 : i32
    return %arg0, %c0_i32 : i32, i32
  }
}

</mosaic_0001>

<bundles_post_ra>
// kernel: tpu_custom_call.1
= control target key start
LH: loop header
LB: loop body
LE: loop exit
PB: predicated region body
PF: predicated region fallthrough
CT: control target
= control target key end

     0   :  { %7 = vsyncpa [#allocation3], 0  ;;  %s326_s0 = inlined_call_operand.hbm [shape: f32[16,128], index: 0, kind: input, shape index: {}]   ;;  %s327_s1 = inlined_call_operand.hbm [shape: f32[16,128], index: 1, kind: input, shape index: {}]   ;;  %s328_s2 = inlined_call_operand.hbm [shape: f32[8,128], index: 2, kind: output, shape index: {}]  }
   0x1   :  { %8 = vsyncpa [#allocation6], 0 }
   0x2   :  { %9 = vsyncpa [#allocation4], 0  ;;  %s246_s9 = smov [#allocation2]   ;;  %s174_s13 = scalar_lea.hbm %s326_s0, 256 }
   0x3   :  { %s19_s10 = sshll.u32 %s246_s9, 4  ;;  %p175_p0 = scmp.ne.s32.totalorder %s326_s0, %s174_s13  ;;  %s20_s10 = int_to_ptr.vmem [resolvable:$true] %s19_s10 }
   0x4   :  { %p178_p1 = scmp.lt.u32.totalorder %s174_s13, %s326_s0 }
   0x6   :  { %p180_p2 = pnand %p178_p1, %p175_p0 }
   0x8   :  { %183 = shalt.err (!%p180_p2)
}
   0x9   :  { %s184_s18 = scalar_lea.vmem %s20_s10, 256  ;;  %p189_p4 = scmp.lt.s32.totalorder %s20_s10, %s20_s10 }
   0xa   :  { %p185_p3 = scmp.ne.s32.totalorder %s20_s10, %s184_s18  ;;  %p190_p5 = scmp.lt.s32.totalorder %s184_s18, %s184_s18 }
   0xc   :  { %p191_p6 = por %p190_p5, %p189_p4 }
   0xe   :  { %p192_p7 = pnand %p191_p6, %p185_p3 }
  0x10   :  { %195 = shalt.err (!%p192_p7)
}
  0x11   :  { %s247_s19 = smov 128   ;;  %s248_s20 = smov 8  }
  0x12   :  { %25 = dma.hbm_to_vmem [thread:$0]  %s326_s0, 256, %s20_s10, [#allocation3], %s247_s19, %s247_s19, %s248_s20  }
  0x13   :  { %s249_s23 = smov [#allocation5]   ;;  %s196_s27 = scalar_lea.hbm %s327_s1, 256 }
  0x14   :  { %s35_s24 = sshll.u32 %s249_s23, 4  ;;  %p197_p8 = scmp.ne.s32.totalorder %s327_s1, %s196_s27  ;;  %s36_s24 = int_to_ptr.vmem [resolvable:$true] %s35_s24 }
  0x15   :  { %p200_p9 = scmp.lt.u32.totalorder %s196_s27, %s327_s1 }
  0x17   :  { %p202_p10 = pnand %p200_p9, %p197_p8 }
  0x19   :  { %205 = shalt.err (!%p202_p10)
}
  0x1a   :  { %s206_s4 = scalar_lea.vmem %s36_s24, 256  ;;  %p211_p12 = scmp.lt.s32.totalorder %s36_s24, %s36_s24 }
  0x1b   :  { %p207_p11 = scmp.ne.s32.totalorder %s36_s24, %s206_s4  ;;  %p212_p13 = scmp.lt.s32.totalorder %s206_s4, %s206_s4 }
  0x1d   :  { %p213_p0 = por %p212_p13, %p211_p12 }
  0x1f   :  { %p214_p1 = pnand %p213_p0, %p207_p11 }
  0x21   :  { %217 = shalt.err (!%p214_p1)
}
  0x22   :  { %41 = dma.hbm_to_vmem [thread:$0]  %s327_s1, 256, %s36_s24, [#allocation6], %s247_s19, %s247_s19, %s248_s20  }
  0x23   :  { %240 = dma.done.wait [#allocation3], 256  }
  0x24   :  { %241 = vsyncadd [#allocation3], 4294967040 }
  0x25   :  { %242 = dma.done.wait [#allocation6], 256  }
  0x26   :  { %243 = vsyncadd [#allocation6], 4294967040  ;;  %v290_v0 = vld [vmem:[#allocation2] sm:$0xff]  ;;  %v292_v1 = vld [vmem:[#allocation2 + $0x8] sm:$0xff]  ;;  %s250_s1 = smov [#allocation7]  }
  0x27   :  { %v61_v2 = vand.u32 2147483647, %v290_v0  ;;  %v62_v3 = vand.u32 2147483647, %v292_v1  ;;  %v59_v27 = vld [vmem:[#allocation5] sm:$0xff]  ;;  %v69_v32 = vmax.f32 %v290_v0, 0.0 }
  0x28   :  { %v71_v33 = vmul.f32 %v59_v27, %v290_v0  ;;  %vm111_vm0 = vcmp.ge.f32.partialorder %v290_v0, 0.0  ;;  %v60_v36 = vld [vmem:[#allocation5 + $0x8] sm:$0xff]  ;;  %v70_v37 = vmax.f32 %v292_v1, 0.0  ;;  %vm112_vm1 = vcmp.ge.f32.partialorder %v292_v1, 0.0  ;;  %s146_s6 = sshll.u32 %s250_s1, 4  ;;  %s147_s6 = int_to_ptr.vmem [resolvable:$true] %s146_s6 }
  0x29   :  { %v63_v4 = vsub.f32 0.0, %v61_v2  ;;  %v64_v5 = vsub.f32 0.0, %v62_v3  ;;  %v72_v40 = vmul.f32 %v60_v36, %v292_v1  ;;  %v127_v43 = vmul.f32 -0.5, %v59_v27  ;;  %s218_s7 = scalar_lea.vmem %s147_s6, 128  ;;  %p223_p3 = scmp.lt.s32.totalorder %s147_s6, %s147_s6 }
  0x2a   :  { %v128_v55 = vmul.f32 -0.5, %v60_v36  ;;  %v73_v56 = vsub.f32 %v69_v32, %v71_v33  ;;  %p219_p2 = scmp.ne.s32.totalorder %s147_s6, %s218_s7  ;;  %p224_p4 = scmp.lt.s32.totalorder %s218_s7, %s218_s7 }
  0x2b   :  { %v65_v6 = vmul.f32 1.442695, %v63_v4  ;;  %v67_v7 = vmul.f32 1.442695, %v64_v5  ;;  %v74_v58 = vsub.f32 %v70_v37, %v72_v40  ;;  %v129_v63 = vadd.f32 0.75, %v127_v43 }
  0x2c   :  { %v130_v1 = vadd.f32 0.75, %v128_v55  ;;  %p225_p5 = por %p224_p4, %p223_p3 }
  0x2d   :  { %162 = vpow2.f32 %v65_v6 }
  0x2e   :  { %164 = vpow2.f32 %v67_v7  ;;  %p226_p6 = pnand %p225_p5, %p219_p2 }
  0x37   :  { %v163_v8 = vpop.eup %162 }
  0x38   :  { %v165_v9 = vpop.eup %164  ;;  %v75_v10 = vadd.f32 1.0, %v163_v8  ;;  %v78_v20 = vmul.f32 -0.5, %v163_v8  ;;  %v81_v25 = vand.u32 2147483647, %v163_v8 }
  0x39   :  { %v84_v11 = vadd.f32 1.0, %v165_v9  ;;  %v87_v21 = vmul.f32 -0.5, %v165_v9  ;;  %v90_v38 = vand.u32 2147483647, %v165_v9 }
  0x3a   :  { %166 = vrcp.f32 %v75_v10  ;;  %v79_v28 = vadd.f32 1.0, %v78_v20  ;;  %vm302_vm2 = vcmp.lt.f32.partialorder %v81_v25, 0.0004427343 }
  0x3b   :  { %168 = vrcp.f32 %v84_v11  ;;  %v88_v29 = vadd.f32 1.0, %v87_v21  ;;  %vm306_vm3 = vcmp.lt.f32.partialorder %v90_v38, 0.0004427343 }
  0x3c   :  { %170 = vlog2.f32 %v75_v10  ;;  %v80_v45 = vmul.f32 %v163_v8, %v79_v28 }
  0x3d   :  { %172 = vlog2.f32 %v84_v11  ;;  %v89_v46 = vmul.f32 %v165_v9, %v88_v29 }
  0x44   :  { %v167_v12 = vpop.eup %166 }
  0x45   :  { %v169_v13 = vpop.eup %168  ;;  %v99_v14 = vmul.f32 %v167_v12, %v75_v10 }
  0x46   :  { %v100_v15 = vmul.f32 %v169_v13, %v84_v11  ;;  %v171_v31 = vpop.eup %170 }
  0x47   :  { %v101_v16 = vsub.f32 2.0, %v99_v14  ;;  %v173_v35 = vpop.eup %172  ;;  %v77_v44 = vmul.f32 0.6931472, %v171_v31 }
  0x48   :  { %v102_v17 = vsub.f32 2.0, %v100_v15  ;;  %v86_v48 = vmul.f32 0.6931472, %v173_v35 }
  0x49   :  { %v103_v18 = vmul.f32 %v167_v12, %v101_v16  ;;  %v83_v59 = vsel %vm302_vm2, %v80_v45, %v77_v44 }
  0x4a   :  { %v104_v19 = vmul.f32 %v169_v13, %v102_v17  ;;  %v92_v61 = vsel %vm306_vm3, %v89_v46, %v86_v48  ;;  %v93_v2 = vadd.f32 %v83_v59, %v73_v56 }
  0x4b   :  { %v105_v22 = vmul.f32 %v103_v18, %v75_v10  ;;  %v94_v4 = vadd.f32 %v92_v61, %v74_v58 }
  0x4c   :  { %v106_v23 = vmul.f32 %v104_v19, %v84_v11 }
  0x4d   :  { %v107_v24 = vsub.f32 2.0, %v105_v22 }
  0x4e   :  { %v108_v26 = vsub.f32 2.0, %v106_v23 }
  0x4f   :  { %v109_v30 = vmul.f32 %v107_v24, %v103_v18 }
  0x50   :  { %v110_v34 = vmul.f32 %v108_v26, %v104_v19 }
  0x51   :  { %v113_v39 = vmul.f32 %v163_v8, %v109_v30 }
  0x52   :  { %v114_v42 = vmul.f32 %v165_v9, %v110_v34 }
  0x53   :  { %v115_v47 = vsel %vm111_vm0, %v109_v30, %v113_v39 }
  0x54   :  { %v116_v49 = vsel %vm112_vm1, %v110_v34, %v114_v42  ;;  %v117_v50 = vadd.f32 %v115_v47, %v59_v27  ;;  %v119_v51 = vmul.f32 2.0, %v115_v47 }
  0x55   :  { %v118_v53 = vadd.f32 %v116_v49, %v60_v36  ;;  %v120_v54 = vmul.f32 2.0, %v116_v49 }
  0x56   :  { %v121_v57 = vmul.f32 %v119_v51, %v59_v27 }
  0x57   :  { %v122_v60 = vmul.f32 %v120_v54, %v60_v36 }
  0x58   :  { %v123_v62 = vsub.f32 %v117_v50, %v121_v57 }
  0x59   :  { %v124_v0 = vsub.f32 %v118_v53, %v122_v60 }
  0x5a   :  { %v125_v3 = vmul.f32 %v123_v62, %v123_v62 }
  0x5b   :  { %v126_v5 = vmul.f32 %v124_v0, %v124_v0 }
  0x5c   :  { %v131_v6 = vmul.f32 %v129_v63, %v125_v3 }
  0x5d   :  { %v132_v7 = vmul.f32 %v130_v1, %v126_v5 }
  0x5e   :  { %v133_v8 = vmul.f32 %v131_v6, %v93_v2 }
  0x5f   :  { %v134_v9 = vmul.f32 %v132_v7, %v94_v4 }
  0x61   :  { %v135_v10 = vadd.f32 %v134_v9, %v133_v8 }
  0x63   :  { %139 = vst [vmem:[#allocation7] sm:$0xff] %v135_v10 }
  0x64   :  { %229 = shalt.err (!%p226_p6)
}
  0x65   :  { %s230_s10 = scalar_lea.hbm %s328_s2, 128 }
  0x66   :  { %p231_p7 = scmp.ne.s32.totalorder %s328_s2, %s230_s10  ;;  %p234_p8 = scmp.lt.u32.totalorder %s230_s10, %s328_s2 }
  0x68   :  { %p236_p9 = pnand %p234_p8, %p231_p7 }
  0x6a   :  { %239 = shalt.err (!%p236_p9)
}
  0x6b   :  { %149 = dma.vmem_to_hbm [thread:$0]  %s147_s6, 128, %s328_s2, [#allocation4]  }
  0x6c   :  { %244 = dma.done.wait [#allocation4], 128  }
  0x6d   :  { %245 = vsyncadd [#allocation4], 4294967168 }
  0x6e   :  { %153 = vsyncpa [#allocation3], 1 }
  0x6f   :  { %154 = vsyncpa [#allocation6], 1 }
  0x70   :  { %155 = vsyncpa [#allocation4], 1 }

</bundles_post_ra>
